<compile_context>
chip_gen: v5e
topology: v5e:2x2
jax: 0.10.0
libtpu: 0.0.40
codegen_flags: <defaults>
</compile_context>

<pallas_src>
import numpy as np
import jax
import jax.numpy as jnp
from jax.experimental import pallas as pl
from jax.experimental.pallas import tpu as pltpu


def _bilinear_matrix(in_size: int, out_size: int) -> np.ndarray:
    """Row-stochastic (out_size, in_size) matrix reproducing PyTorch's
    upsample_bilinear2d with align_corners=False (half-pixel centers)."""
    scale = in_size / out_size
    dst = np.arange(out_size, dtype=np.float64)
    src = (dst + 0.5) * scale - 0.5
    src = np.maximum(src, 0.0)                     # PyTorch clamps negatives to 0
    i0 = np.minimum(np.floor(src).astype(np.int64), in_size - 1)
    i1 = np.minimum(i0 + 1, in_size - 1)
    w1 = src - i0
    w0 = 1.0 - w1
    mat = np.zeros((out_size, in_size), dtype=np.float32)
    rows = np.arange(out_size)
    np.add.at(mat, (rows, i0), w0.astype(np.float32))
    np.add.at(mat, (rows, i1), w1.astype(np.float32))
    return mat


def _interp_kernel(x_ref, wkt_ref, o_ref):
    # x_ref  : (pb, H*W)            row block of flattened input planes
    # wkt_ref: (H*W, out*out)       fused Kronecker interpolation weight
    # o_ref  : (pb, out*out)
    o_ref[...] = jnp.dot(
        x_ref[...], wkt_ref[...], preferred_element_type=jnp.float32
    ).astype(o_ref.dtype)


def _pad128(n: int) -> int:
    return ((n + 127) // 128) * 128


def _pick_row_block(P: int, in_cols: int, out_cols: int, itemsize: int) -> int:
    """Largest row block whose double-buffered in+out VMEM blocks (with lane
    padding to 128) plus the f32 matmul result stay within ~12 MiB, so it fits
    the scoped-VMEM default on every generation (including v7x)."""
    in_lanes = _pad128(in_cols)
    out_lanes = _pad128(out_cols)
    # double-buffered input + output blocks, plus the f32 accumulator result
    per_row = 2 * (in_lanes + out_lanes) * itemsize + out_lanes * 4
    budget = 12 * 1024 * 1024
    pb = max(1, budget // max(per_row, 1))
    if pb >= P:
        return P                      # single full-array block (no 8-divisibility needed)
    pb = max(8, (pb // 8) * 8)        # sublane-aligned block
    q = pb                            # prefer a block that divides P (no ragged tail)
    while q >= 8 and P % q != 0:
        q -= 8
    if q >= 8 and P % q == 0:
        return q
    return pb                         # ragged tail is fine: rows are independent


def _interpolate_nchw(x: jnp.ndarray, out_sz: int) -> jnp.ndarray:
    N, C, H, W = x.shape
    if not jnp.issubdtype(x.dtype, jnp.floating):
        x = x.astype(jnp.float32)     # fractional weights need a float compute dtype
    cdt = x.dtype                     # compute/store dtype; accumulation is always f32

    wh = _bilinear_matrix(H, out_sz)                       # (out, H)
    ww = _bilinear_matrix(W, out_sz)                       # (out, W)
    wkt = jnp.asarray(np.kron(wh, ww).T, dtype=cdt)        # (H*W, out*out)

    P = N * C
    in_cols = H * W
    out_cols = out_sz * out_sz
    x2 = x.reshape(P, in_cols)                             # free reshape (contiguous NCHW)

    pb = _pick_row_block(P, in_cols, out_cols, x.dtype.itemsize)
    grid = (pl.cdiv(P, pb),)

    flops = 2 * P * in_cols * out_cols
    bytes_accessed = (x2.size * x2.dtype.itemsize
                      + P * out_cols * x2.dtype.itemsize
                      + wkt.size * wkt.dtype.itemsize)

    out2 = pl.pallas_call(
        _interp_kernel,
        out_shape=jax.ShapeDtypeStruct((P, out_cols), cdt),
        grid_spec=pltpu.PrefetchScalarGridSpec(
            num_scalar_prefetch=0,
            grid=grid,
            in_specs=[
                pl.BlockSpec((pb, in_cols), lambda i: (i, 0)),
                pl.BlockSpec((in_cols, out_cols), lambda i: (0, 0)),
            ],
            out_specs=pl.BlockSpec((pb, out_cols), lambda i: (i, 0)),
        ),
        compiler_params=pltpu.CompilerParams(
            dimension_semantics=("parallel",),
            vmem_limit_bytes=32 * 1024 * 1024),
        cost_estimate=pl.CostEstimate(flops=flops, transcendentals=0,
                                      bytes_accessed=bytes_accessed),
    )(x2, wkt)

    return out2.reshape(N, C, out_sz, out_sz)              # free reshape back to NCHW


class Interpolate:
    """JAX/Pallas port of CS236Project.Models.Interpolate."""

    def __init__(self, out_sz: int):
        self.out_sz = out_sz

    def go(self, x):
        assert x.ndim == 4
        res = _interpolate_nchw(x, self.out_sz)
        assert res.shape[1] == 3
        assert res.shape[0] == x.shape[0]
        return res

    def __call__(self, x):
        if x.ndim == 3:
            return self.go(x[None, ...])[0]
        return self.go(x)


if __name__ == "__main__":
    key = jax.random.PRNGKey(0)
    # Input must have 3 channels (module asserts res.size(1) == 3).
    x = jax.random.normal(key, (2, 3, 16, 16), dtype=jnp.float32)
    out_sz = 8
    model = Interpolate(out_sz)

    out = jax.block_until_ready(model(x))            # 4-D path
    assert out.shape == (2, 3, out_sz, out_sz)

    out3 = jax.block_until_ready(model(x[0]))        # 3-D path (unsqueeze / squeeze)
    assert out3.shape == (3, out_sz, out_sz)

    # Sanity-check the fused Kronecker matmul against the separable form in plain JAX.
    wh_f = jnp.asarray(_bilinear_matrix(16, out_sz))
    ww_f = jnp.asarray(_bilinear_matrix(16, out_sz))
    ref = jnp.einsum('oh,nchw,qw->ncoq', wh_f, x, ww_f)
    np.testing.assert_allclose(np.asarray(out), np.asarray(ref), rtol=1e-5, atol=1e-5)
    np.testing.assert_allclose(np.asarray(out3), np.asarray(ref[0]), rtol=1e-5, atol=1e-5)

    print("KERNEL_OK")
</pallas_src>

<mosaic_0001>
module attributes {stable_mosaic.version = 11 : i64} {
  func.func @_interp_kernel(%arg0: i32, %arg1: memref<6x256xf32, #tpu.memory_space<vmem>>, %arg2: memref<256x64xf32, #tpu.memory_space<vmem>>, %arg3: memref<6x64xf32, #tpu.memory_space<vmem>>) attributes {dimension_semantics = [#tpu.dimension_semantics<parallel>], iteration_bounds = array<i64: 1>, scalar_prefetch = 0 : i64, scratch_operands = 0 : i64, tpu.core_type = #tpu.core_type<tc>, window_params = [{transform_indices = @transform_0, window_bounds = array<i64: 6, 256>}, {pipeline_mode = #tpu.pipeline_mode<synchronous>, transform_indices = @transform_1, window_bounds = array<i64: 256, 64>}, {transform_indices = @transform_2, window_bounds = array<i64: 6, 64>}]} {
    %c0 = arith.constant 0 : index
    %c0_0 = arith.constant 0 : index
    %0 = vector.load %arg1[%c0, %c0_0] : memref<6x256xf32, #tpu.memory_space<vmem>>, vector<6x256xf32>
    %c0_1 = arith.constant 0 : index
    %c0_2 = arith.constant 0 : index
    %1 = vector.load %arg2[%c0_1, %c0_2] : memref<256x64xf32, #tpu.memory_space<vmem>>, vector<256x64xf32>
    %cst = arith.constant dense<0.000000e+00> : vector<6x64xf32>
    %2 = tpu.matmul %0, %1, %cst {dimension_numbers = #tpu.dot_dimension_numbers<[1], [0], [0], [1], [0, 0, 1, 1], [], []>} : vector<6x256xf32>, vector<256x64xf32>, vector<6x64xf32> -> vector<6x64xf32>
    %c0_3 = arith.constant 0 : index
    %c0_4 = arith.constant 0 : index
    %3 = vector.load %arg3[%c0_3, %c0_4] : memref<6x64xf32, #tpu.memory_space<vmem>>, vector<6x64xf32>
    tpu.vector_store %arg3[%c0_3, %c0_4], %2 {strides = array<i32>} : memref<6x64xf32, #tpu.memory_space<vmem>>, vector<6x64xf32>,
    return
  }
  func.func @transform_0(%arg0: i32) -> (i32, i32) {
    %c0_i32 = arith.constant 0 : i32
    %c0_i32_0 = arith.constant 0 : i32
    return %arg0, %c0_i32 : i32, i32
  }
  func.func @transform_1(%arg0: i32) -> (i32, i32) {
    %c0_i32 = arith.constant 0 : i32
    %c0_i32_0 = arith.constant 0 : i32
    %c0_i32_1 = arith.constant 0 : i32
    return %c0_i32, %c0_i32_0 : i32, i32
  }
  func.func @transform_2(%arg0: i32) -> (i32, i32) {
    %c0_i32 = arith.constant 0 : i32
    %c0_i32_0 = arith.constant 0 : i32
    return %arg0, %c0_i32 : i32, i32
  }
}

</mosaic_0001>

<bundles_post_ra>
// kernel: tpu_custom_call.1
= control target key start
LH: loop header
LB: loop body
LE: loop exit
PB: predicated region body
PF: predicated region fallthrough
CT: control target
= control target key end

     0   :  { %s252_s0 = inlined_call_operand.vmem [shape: f32[6,256], index: 0, kind: input, shape index: {}]   ;;  %s253_s1 = inlined_call_operand.vmem [shape: f32[256,64], index: 1, kind: input, shape index: {}]   ;;  %s254_s2 = inlined_call_operand.hbm [shape: f32[6,64], index: 2, kind: output, shape index: {}]  }
   0x1   :  { %v29_v0 = vld [vmem:[%s253_s1 + $0x78] sm:$0xff]  ;;  %v28_v2 = vld [vmem:[%s253_s1 + $0x70] sm:$0xff]  ;;  %v27_v4 = vld [vmem:[%s253_s1 + $0x68] sm:$0xff] }
   0x2   :  { %v45_v1 = vld [vmem:[%s253_s1 + $0xf8] sm:$0xff]  ;;  %46 = vmatpush.msra.mxu0 %v29_v0  ;;  %v44_v3 = vld [vmem:[%s253_s1 + $0xf0] sm:$0xff]  ;;  %v43_v5 = vld [vmem:[%s253_s1 + $0xe8] sm:$0xff] }
   0x3   :  { %66 = vmatpush.msra.mxu1 %v45_v1  ;;  %v26_v6 = vld [vmem:[%s253_s1 + $0x60] sm:$0xff]  ;;  %v25_v8 = vld [vmem:[%s253_s1 + $0x58] sm:$0xff]  ;;  %v24_v10 = vld [vmem:[%s253_s1 + $0x50] sm:$0xff] }
   0x4   :  { %47 = vmatpush.msra.mxu0 %v28_v2  ;;  %v42_v7 = vld [vmem:[%s253_s1 + $0xe0] sm:$0xff]  ;;  %v41_v9 = vld [vmem:[%s253_s1 + $0xd8] sm:$0xff]  ;;  %v40_v11 = vld [vmem:[%s253_s1 + $0xd0] sm:$0xff] }
   0x5   :  { %67 = vmatpush.msra.mxu1 %v44_v3  ;;  %v23_v12 = vld [vmem:[%s253_s1 + $0x48] sm:$0xff] }
   0x6   :  { %48 = vmatpush.msra.mxu0 %v27_v4  ;;  %v39_v13 = vld [vmem:[%s253_s1 + $0xc8] sm:$0xff] }
   0x7   :  { %68 = vmatpush.msra.mxu1 %v43_v5 }
   0x8   :  { %49 = vmatpush.msra.mxu0 %v26_v6 }
   0x9   :  { %69 = vmatpush.msra.mxu1 %v42_v7 }
   0xa   :  { %50 = vmatpush.msra.mxu0 %v25_v8 }
   0xb   :  { %70 = vmatpush.msra.mxu1 %v41_v9 }
   0xc   :  { %51 = vmatpush.msra.mxu0 %v24_v10 }
   0xd   :  { %71 = vmatpush.msra.mxu1 %v40_v11 }
   0xe   :  { %7 = vsyncpa [#allocation3], 0  ;;  %v22_v14 = vld [vmem:[%s253_s1 + $0x40] sm:$0xff]  ;;  %52 = vmatpush.msra.mxu0 %v23_v12  ;;  %v21_v16 = vld [vmem:[%s253_s1 + $0x38] sm:$0xff]  ;;  %s131_s21 = smov [#allocation2]   ;;  %vm86_vm0 = vcmask 521216  }
   0xf   :  { %v38_v15 = vld [vmem:[%s253_s1 + $0xc0] sm:$0xff]  ;;  %72 = vmatpush.msra.mxu1 %v39_v13  ;;  %v37_v17 = vld [vmem:[%s253_s1 + $0xb8] sm:$0xff]  ;;  %v20_v18 = vld [vmem:[%s253_s1 + $0x30] sm:$0xff]  ;;  %s93_s22 = sshll.u32 %s131_s21, 4  ;;  %s94_s22 = int_to_ptr.vmem [resolvable:$true] %s93_s22 }
  0x10   :  { %53 = vmatpush.msra.mxu0 %v22_v14  ;;  %v36_v19 = vld [vmem:[%s253_s1 + $0xb0] sm:$0xff]  ;;  %v19_v20 = vld [vmem:[%s253_s1 + $0x28] sm:$0xff]  ;;  %v18_v22 = vld [vmem:[%s253_s1 + $0x20] sm:$0xff] }
  0x11   :  { %73 = vmatpush.msra.mxu1 %v38_v15  ;;  %v35_v21 = vld [vmem:[%s253_s1 + $0xa8] sm:$0xff]  ;;  %v34_v23 = vld [vmem:[%s253_s1 + $0xa0] sm:$0xff]  ;;  %v17_v24 = vld [vmem:[%s253_s1 + $0x18] sm:$0xff] }
  0x12   :  { %54 = vmatpush.msra.mxu0 %v21_v16  ;;  %v33_v25 = vld [vmem:[%s253_s1 + $0x98] sm:$0xff]  ;;  %v16_v26 = vld [vmem:[%s253_s1 + $0x10] sm:$0xff]  ;;  %v15_v28 = vld [vmem:[%s253_s1 + $0x8] sm:$0xff] }
  0x13   :  { %74 = vmatpush.msra.mxu1 %v37_v17  ;;  %v32_v27 = vld [vmem:[%s253_s1 + $0x90] sm:$0xff]  ;;  %v31_v29 = vld [vmem:[%s253_s1 + $0x88] sm:$0xff]  ;;  %v14_v30 = vld [vmem:[%s253_s1] sm:$0xff] }
  0x14   :  { %55 = vmatpush.msra.mxu0 %v20_v18  ;;  %v30_v31 = vld [vmem:[%s253_s1 + $0x80] sm:$0xff]  ;;  %v13_v33 = vld [vmem:[%s252_s0 + $0x8] sm:$0x3f]  ;;  %s95_s1 = sshll.u32 %s254_s2, 4  ;;  %s96_s1 = int_to_ptr.hbm [resolvable:$true] %s95_s1 }
  0x15   :  { %75 = vmatpush.msra.mxu1 %v36_v19  ;;  %v12_v32 = vld [vmem:[%s252_s0] sm:$0x3f] }
  0x16   :  { %56 = vmatpush.msra.mxu0 %v19_v20 }
  0x17   :  { %76 = vmatpush.msra.mxu1 %v35_v21 }
  0x18   :  { %57 = vmatpush.msra.mxu0 %v18_v22 }
  0x19   :  { %77 = vmatpush.msra.mxu1 %v34_v23 }
  0x1a   :  { %58 = vmatpush.msra.mxu0 %v17_v24 }
  0x1b   :  { %78 = vmatpush.msra.mxu1 %v33_v25 }
  0x1c   :  { %59 = vmatpush.msra.mxu0 %v16_v26 }
  0x1d   :  { %79 = vmatpush.msra.mxu1 %v32_v27 }
  0x1e   :  { %60 = vmatpush.msra.mxu0 %v15_v28 }
  0x1f   :  { %80 = vmatpush.msra.mxu1 %v31_v29 }
  0x20   :  { %61 = vmatpush.msra.mxu0 %v14_v30 }
  0x21   :  { %81 = vmatpush.msra.mxu1 %v30_v31  ;;  %62 = vmatmul.f32.vlgmr.msra.gmra.mxu0 %v12_v32 }
  0x22   :  { %82 = vmatmul.f32.vlgmr.msra.gmra.mxu1 %v13_v33 }
  0x9e   :  { %v63_v34 = vpop.f32.mrf.mxu0 }
  0x9f   :  { %v83_v35 = vpop.f32.mrf.mxu1 }
  0xa0   :  { %v84_v36 = vadd.f32 %v83_v35, %v63_v34 }
  0xa2   :  { %87 = vst.msk [vmem:[#allocation2] sm:$0x3f] %vm86_vm0, %v84_v36 }
  0xa3   :  { %98 = dma.vmem_to_hbm [thread:$0]  %s94_s22, 128, %s96_s1, [#allocation3]  }
  0xa4   :  { %129 = dma.done.wait [#allocation3], 128  }
  0xa5   :  { %130 = vsyncadd [#allocation3], 4294967168 }
  0xa6   :  { %103 = vsyncpa [#allocation3], 1 }

</bundles_post_ra>
